<compile_context>
chip_gen: v5e
topology: v5e:2x2
jax: 0.10.0
libtpu: 0.0.40
codegen_flags: <defaults>
</compile_context>

<pallas_src>
import jax
import jax.numpy as jnp
from jax.experimental import pallas as pl
from jax.experimental.pallas import tpu as pltpu


def icm_kernel(obs_ref, act_ref, nobs_ref,
               w1f_o_ref, w1f_a_ref, b1f_ref, w2f_ref, b2f_ref,
               w1b_o_ref, w1b_n_ref, b1b_ref, w2b_ref, b2b_ref,
               ferr_ref, berr_ref):
    obs = obs_ref[...]      # (TB, obs_dim)
    act = act_ref[...]      # (TB, action_dim)
    nobs = nobs_ref[...]    # (TB, obs_dim)

    # forward_net: Linear(cat[obs, act]) -> ReLU -> Linear
    # cat + single dot replaced by two split dots on pre-sliced weight halves.
    h_f = (jnp.dot(obs, w1f_o_ref[...], preferred_element_type=jnp.float32)
           + jnp.dot(act, w1f_a_ref[...], preferred_element_type=jnp.float32)
           + b1f_ref[...])
    h_f = jnp.maximum(h_f, 0.0)
    nobs_hat = (jnp.dot(h_f, w2f_ref[...], preferred_element_type=jnp.float32)
                + b2f_ref[...])

    # backward_net: Linear(cat[obs, next_obs]) -> ReLU -> Linear -> Tanh
    h_b = (jnp.dot(obs, w1b_o_ref[...], preferred_element_type=jnp.float32)
           + jnp.dot(nobs, w1b_n_ref[...], preferred_element_type=jnp.float32)
           + b1b_ref[...])
    h_b = jnp.maximum(h_b, 0.0)
    act_hat = jnp.tanh(jnp.dot(h_b, w2b_ref[...], preferred_element_type=jnp.float32)
                       + b2b_ref[...])

    # Row-wise L2 norms, produced with the batch tile on the LANE axis so the
    # output store is a dense (1, 1, TB) row rather than a masked column.
    d_f = nobs - nobs_hat                       # (TB, obs_dim)
    d_b = act - act_hat                         # (TB, action_dim)
    sq_f_t = (d_f * d_f).T                      # (obs_dim, TB)    XLU transpose
    sq_b_t = (d_b * d_b).T                      # (action_dim, TB)
    ferr_ref[...] = jnp.sqrt(jnp.sum(sq_f_t, axis=0, keepdims=True))[None]  # (1,1,TB)
    berr_ref[...] = jnp.sqrt(jnp.sum(sq_b_t, axis=0, keepdims=True))[None]  # (1,1,TB)


def _round_up(x, m):
    return ((x + m - 1) // m) * m


def icm_forward(obs, action, next_obs, params, *, tb=512):
    assert obs.shape[0] == next_obs.shape[0]
    assert obs.shape[0] == action.shape[0]
    B, obs_dim = obs.shape
    act_dim = action.shape[1]
    hidden = params["w1f"].shape[1]

    # ---- batch tile selection -------------------------------------------
    # Only pad to the sublane multiple (8); cap the tile at the padded batch.
    tb_eff = max(8, _round_up(min(tb, _round_up(B, 8)), 8))
    num_tiles = pl.cdiv(B, tb_eff)
    # Prefer >=2 grid steps when the batch allows it so the "parallel" axis
    # can shard across both TensorCores on megacore parts (v7x).
    if num_tiles < 2 and B > 8:
        tb_eff = max(8, _round_up(pl.cdiv(B, 2), 8))
        num_tiles = pl.cdiv(B, tb_eff)
    b_pad = num_tiles * tb_eff
    pad = b_pad - B
    if pad:
        obs_p = jnp.pad(obs, ((0, pad), (0, 0)))
        act_p = jnp.pad(action, ((0, pad), (0, 0)))
        nobs_p = jnp.pad(next_obs, ((0, pad), (0, 0)))
    else:
        obs_p, act_p, nobs_p = obs, action, next_obs

    # ---- weights: pre-slice first-layer halves (one-time XLA slices) ----
    w1f_o = params["w1f"][:obs_dim]          # (obs_dim, hidden)
    w1f_a = params["w1f"][obs_dim:]          # (act_dim, hidden)
    w1b_o = params["w1b"][:obs_dim]          # (obs_dim, hidden)
    w1b_n = params["w1b"][obs_dim:]          # (obs_dim, hidden)
    weights = (w1f_o, w1f_a, params["b1f"], params["w2f"], params["b2f"],
               w1b_o, w1b_n, params["b1b"], params["w2b"], params["b2b"])

    # ---- specs ------------------------------------------------------------
    # Streamed (batch-tiled) activations: each streamed exactly once.
    stream_specs = [
        pl.BlockSpec((tb_eff, obs_dim), lambda i: (i, 0)),
        pl.BlockSpec((tb_eff, act_dim), lambda i: (i, 0)),
        pl.BlockSpec((tb_eff, obs_dim), lambda i: (i, 0)),
    ]
    # VMEM-resident weights/biases: full-array blocks, constant index_map.
    weight_specs = [pl.BlockSpec(w.shape, lambda i: (0, 0)) for w in weights]

    out_specs = (pl.BlockSpec((1, 1, tb_eff), lambda i: (i, 0, 0)),
                 pl.BlockSpec((1, 1, tb_eff), lambda i: (i, 0, 0)))
    out_shape = (jax.ShapeDtypeStruct((num_tiles, 1, tb_eff), jnp.float32),
                 jax.ShapeDtypeStruct((num_tiles, 1, tb_eff), jnp.float32))

    # Advisory cost estimate so XLA schedules neighbors around this call.
    flops = 2 * b_pad * ((obs_dim + act_dim) * hidden + hidden * obs_dim
                         + 2 * obs_dim * hidden + hidden * act_dim)
    bytes_accessed = 4 * (b_pad * (2 * obs_dim + act_dim)
                          + sum(int(w.size) for w in weights) + 2 * b_pad)
    cost = pl.CostEstimate(flops=int(flops),
                           transcendentals=int(b_pad * act_dim),
                           bytes_accessed=int(bytes_accessed))

    ferr_t, berr_t = pl.pallas_call(
        icm_kernel,
        out_shape=out_shape,
        grid_spec=pl.GridSpec(
            grid=(num_tiles,),
            in_specs=stream_specs + weight_specs,
            out_specs=out_specs),
        compiler_params=pltpu.CompilerParams(
            dimension_semantics=("parallel",)),
        cost_estimate=cost,
    )(obs_p, act_p, nobs_p, *weights)

    # (num_tiles, 1, TB) -> (B, 1); flattened order equals batch order.
    ferr = ferr_t.reshape(b_pad, 1)[:B]
    berr = berr_t.reshape(b_pad, 1)[:B]
    return ferr, berr


def init_params(key, obs_dim, action_dim, hidden_dim):
    """Deterministic synthetic init (fan-in-scaled normal).
    # TODO(synk): utils.weight_init is project-specific; init choice does not
    # affect the forward-pass semantics being tested.
    """
    ks = jax.random.split(key, 4)

    def lin(k, fan_in, fan_out):
        scale = 1.0 / jnp.sqrt(jnp.float32(fan_in))
        w = jax.random.normal(k, (fan_in, fan_out), jnp.float32) * scale
        b = jnp.zeros((1, fan_out), jnp.float32)
        return w, b

    w1f, b1f = lin(ks[0], obs_dim + action_dim, hidden_dim)
    w2f, b2f = lin(ks[1], hidden_dim, obs_dim)
    w1b, b1b = lin(ks[2], 2 * obs_dim, hidden_dim)
    w2b, b2b = lin(ks[3], hidden_dim, action_dim)

    return {"w1f": w1f, "b1f": b1f, "w2f": w2f, "b2f": b2f,
            "w1b": w1b, "b1b": b1b, "w2b": w2b, "b2b": b2b}


def icm_reference(obs, action, next_obs, params):
    """Pure-JAX reference mirroring the PyTorch module."""
    x_f = jnp.concatenate([obs, action], axis=-1)
    h_f = jnp.maximum(x_f @ params["w1f"] + params["b1f"], 0.0)
    nobs_hat = h_f @ params["w2f"] + params["b2f"]

    x_b = jnp.concatenate([obs, next_obs], axis=-1)
    h_b = jnp.maximum(x_b @ params["w1b"] + params["b1b"], 0.0)
    act_hat = jnp.tanh(h_b @ params["w2b"] + params["b2b"])

    ferr = jnp.linalg.norm(next_obs - nobs_hat, axis=-1, keepdims=True)
    berr = jnp.linalg.norm(action - act_hat, axis=-1, keepdims=True)
    return ferr, berr


if __name__ == "__main__":
    B, OBS_DIM, ACT_DIM, HIDDEN = 8, 16, 8, 32

    key = jax.random.PRNGKey(0)
    k_obs, k_act, k_nobs, k_params = jax.random.split(key, 4)

    obs = jax.random.normal(k_obs, (B, OBS_DIM), jnp.float32)
    action = jnp.tanh(jax.random.normal(k_act, (B, ACT_DIM), jnp.float32))
    next_obs = jax.random.normal(k_nobs, (B, OBS_DIM), jnp.float32)

    params = init_params(k_params, OBS_DIM, ACT_DIM, HIDDEN)

    ferr, berr = icm_forward(obs, action, next_obs, params)
    jax.block_until_ready((ferr, berr))

    ferr_ref, berr_ref = icm_reference(obs, action, next_obs, params)
    assert ferr.shape == (B, 1) and berr.shape == (B, 1)
    assert jnp.allclose(ferr, ferr_ref, atol=1e-5, rtol=1e-5)
    assert jnp.allclose(berr, berr_ref, atol=1e-5, rtol=1e-5)

    print("KERNEL_OK")
</pallas_src>

<mosaic_0001>
module attributes {stable_mosaic.version = 11 : i64} {
  func.func @icm_kernel(%arg0: i32, %arg1: memref<8x16xf32, #tpu.memory_space<vmem>>, %arg2: memref<8x8xf32, #tpu.memory_space<vmem>>, %arg3: memref<8x16xf32, #tpu.memory_space<vmem>>, %arg4: memref<16x32xf32, #tpu.memory_space<vmem>>, %arg5: memref<8x32xf32, #tpu.memory_space<vmem>>, %arg6: memref<1x32xf32, #tpu.memory_space<vmem>>, %arg7: memref<32x16xf32, #tpu.memory_space<vmem>>, %arg8: memref<1x16xf32, #tpu.memory_space<vmem>>, %arg9: memref<16x32xf32, #tpu.memory_space<vmem>>, %arg10: memref<16x32xf32, #tpu.memory_space<vmem>>, %arg11: memref<1x32xf32, #tpu.memory_space<vmem>>, %arg12: memref<32x8xf32, #tpu.memory_space<vmem>>, %arg13: memref<1x8xf32, #tpu.memory_space<vmem>>, %arg14: memref<1x1x8xf32, #tpu.memory_space<vmem>>, %arg15: memref<1x1x8xf32, #tpu.memory_space<vmem>>) attributes {dimension_semantics = [#tpu.dimension_semantics<parallel>], iteration_bounds = array<i64: 1>, scalar_prefetch = 0 : i64, scratch_operands = 0 : i64, tpu.core_type = #tpu.core_type<tc>, window_params = [{transform_indices = @transform_0, window_bounds = array<i64: 8, 16>}, {transform_indices = @transform_1, window_bounds = array<i64: 8, 8>}, {transform_indices = @transform_2, window_bounds = array<i64: 8, 16>}, {pipeline_mode = #tpu.pipeline_mode<synchronous>, transform_indices = @transform_3, window_bounds = array<i64: 16, 32>}, {pipeline_mode = #tpu.pipeline_mode<synchronous>, transform_indices = @transform_4, window_bounds = array<i64: 8, 32>}, {pipeline_mode = #tpu.pipeline_mode<synchronous>, transform_indices = @transform_5, window_bounds = array<i64: 1, 32>}, {pipeline_mode = #tpu.pipeline_mode<synchronous>, transform_indices = @transform_6, window_bounds = array<i64: 32, 16>}, {pipeline_mode = #tpu.pipeline_mode<synchronous>, transform_indices = @transform_7, window_bounds = array<i64: 1, 16>}, {pipeline_mode = #tpu.pipeline_mode<synchronous>, transform_indices = @transform_8, window_bounds = array<i64: 16, 32>}, {pipeline_mode = #tpu.pipeline_mode<synchronous>, transform_indices = @transform_9, window_bounds = array<i64: 16, 32>}, {pipeline_mode = #tpu.pipeline_mode<synchronous>, transform_indices = @transform_10, window_bounds = array<i64: 1, 32>}, {pipeline_mode = #tpu.pipeline_mode<synchronous>, transform_indices = @transform_11, window_bounds = array<i64: 32, 8>}, {pipeline_mode = #tpu.pipeline_mode<synchronous>, transform_indices = @transform_12, window_bounds = array<i64: 1, 8>}, {transform_indices = @transform_13, window_bounds = array<i64: 1, 1, 8>}, {transform_indices = @transform_14, window_bounds = array<i64: 1, 1, 8>}]} {
    %c0 = arith.constant 0 : index
    %c0_0 = arith.constant 0 : index
    %0 = vector.load %arg1[%c0, %c0_0] : memref<8x16xf32, #tpu.memory_space<vmem>>, vector<8x16xf32>
    %c0_1 = arith.constant 0 : index
    %c0_2 = arith.constant 0 : index
    %1 = vector.load %arg2[%c0_1, %c0_2] : memref<8x8xf32, #tpu.memory_space<vmem>>, vector<8x8xf32>
    %c0_3 = arith.constant 0 : index
    %c0_4 = arith.constant 0 : index
    %2 = vector.load %arg3[%c0_3, %c0_4] : memref<8x16xf32, #tpu.memory_space<vmem>>, vector<8x16xf32>
    %c0_5 = arith.constant 0 : index
    %c0_6 = arith.constant 0 : index
    %3 = vector.load %arg4[%c0_5, %c0_6] : memref<16x32xf32, #tpu.memory_space<vmem>>, vector<16x32xf32>
    %cst = arith.constant dense<0.000000e+00> : vector<8x32xf32>
    %4 = tpu.matmul %0, %3, %cst {dimension_numbers = #tpu.dot_dimension_numbers<[1], [0], [0], [1], [0, 0, 1, 1], [], []>} : vector<8x16xf32>, vector<16x32xf32>, vector<8x32xf32> -> vector<8x32xf32>
    %c0_7 = arith.constant 0 : index
    %c0_8 = arith.constant 0 : index
    %5 = vector.load %arg5[%c0_7, %c0_8] : memref<8x32xf32, #tpu.memory_space<vmem>>, vector<8x32xf32>
    %cst_9 = arith.constant dense<0.000000e+00> : vector<8x32xf32>
    %6 = tpu.matmul %1, %5, %cst_9 {dimension_numbers = #tpu.dot_dimension_numbers<[1], [0], [0], [1], [0, 0, 1, 1], [], []>} : vector<8x8xf32>, vector<8x32xf32>, vector<8x32xf32> -> vector<8x32xf32>
    %7 = arith.addf %4, %6 : vector<8x32xf32>
    %c0_10 = arith.constant 0 : index
    %c0_11 = arith.constant 0 : index
    %8 = vector.load %arg6[%c0_10, %c0_11] : memref<1x32xf32, #tpu.memory_space<vmem>>, vector<1x32xf32>
    %9 = vector.broadcast %8 : vector<1x32xf32> to vector<8x32xf32>
    %10 = arith.addf %7, %9 : vector<8x32xf32>
    %cst_12 = arith.constant 0.000000e+00 : f32
    %11 = vector.broadcast %cst_12 : f32 to vector<8x32xf32>
    %12 = arith.maximumf %10, %11 : vector<8x32xf32>
    %c0_13 = arith.constant 0 : index
    %c0_14 = arith.constant 0 : index
    %13 = vector.load %arg7[%c0_13, %c0_14] : memref<32x16xf32, #tpu.memory_space<vmem>>, vector<32x16xf32>
    %cst_15 = arith.constant dense<0.000000e+00> : vector<8x16xf32>
    %14 = tpu.matmul %12, %13, %cst_15 {dimension_numbers = #tpu.dot_dimension_numbers<[1], [0], [0], [1], [0, 0, 1, 1], [], []>} : vector<8x32xf32>, vector<32x16xf32>, vector<8x16xf32> -> vector<8x16xf32>
    %c0_16 = arith.constant 0 : index
    %c0_17 = arith.constant 0 : index
    %15 = vector.load %arg8[%c0_16, %c0_17] : memref<1x16xf32, #tpu.memory_space<vmem>>, vector<1x16xf32>
    %16 = vector.broadcast %15 : vector<1x16xf32> to vector<8x16xf32>
    %17 = arith.addf %14, %16 : vector<8x16xf32>
    %c0_18 = arith.constant 0 : index
    %c0_19 = arith.constant 0 : index
    %18 = vector.load %arg9[%c0_18, %c0_19] : memref<16x32xf32, #tpu.memory_space<vmem>>, vector<16x32xf32>
    %cst_20 = arith.constant dense<0.000000e+00> : vector<8x32xf32>
    %19 = tpu.matmul %0, %18, %cst_20 {dimension_numbers = #tpu.dot_dimension_numbers<[1], [0], [0], [1], [0, 0, 1, 1], [], []>} : vector<8x16xf32>, vector<16x32xf32>, vector<8x32xf32> -> vector<8x32xf32>
    %c0_21 = arith.constant 0 : index
    %c0_22 = arith.constant 0 : index
    %20 = vector.load %arg10[%c0_21, %c0_22] : memref<16x32xf32, #tpu.memory_space<vmem>>, vector<16x32xf32>
    %cst_23 = arith.constant dense<0.000000e+00> : vector<8x32xf32>
    %21 = tpu.matmul %2, %20, %cst_23 {dimension_numbers = #tpu.dot_dimension_numbers<[1], [0], [0], [1], [0, 0, 1, 1], [], []>} : vector<8x16xf32>, vector<16x32xf32>, vector<8x32xf32> -> vector<8x32xf32>
    %22 = arith.addf %19, %21 : vector<8x32xf32>
    %c0_24 = arith.constant 0 : index
    %c0_25 = arith.constant 0 : index
    %23 = vector.load %arg11[%c0_24, %c0_25] : memref<1x32xf32, #tpu.memory_space<vmem>>, vector<1x32xf32>
    %24 = vector.broadcast %23 : vector<1x32xf32> to vector<8x32xf32>
    %25 = arith.addf %22, %24 : vector<8x32xf32>
    %cst_26 = arith.constant 0.000000e+00 : f32
    %26 = vector.broadcast %cst_26 : f32 to vector<8x32xf32>
    %27 = arith.maximumf %25, %26 : vector<8x32xf32>
    %c0_27 = arith.constant 0 : index
    %c0_28 = arith.constant 0 : index
    %28 = vector.load %arg12[%c0_27, %c0_28] : memref<32x8xf32, #tpu.memory_space<vmem>>, vector<32x8xf32>
    %cst_29 = arith.constant dense<0.000000e+00> : vector<8x8xf32>
    %29 = tpu.matmul %27, %28, %cst_29 {dimension_numbers = #tpu.dot_dimension_numbers<[1], [0], [0], [1], [0, 0, 1, 1], [], []>} : vector<8x32xf32>, vector<32x8xf32>, vector<8x8xf32> -> vector<8x8xf32>
    %c0_30 = arith.constant 0 : index
    %c0_31 = arith.constant 0 : index
    %30 = vector.load %arg13[%c0_30, %c0_31] : memref<1x8xf32, #tpu.memory_space<vmem>>, vector<1x8xf32>
    %31 = vector.broadcast %30 : vector<1x8xf32> to vector<8x8xf32>
    %32 = arith.addf %29, %31 : vector<8x8xf32>
    %33 = math.tanh %32 : vector<8x8xf32>
    %34 = arith.subf %2, %17 : vector<8x16xf32>
    %35 = arith.subf %1, %33 : vector<8x8xf32>
    %36 = arith.mulf %34, %34 : vector<8x16xf32>
    %37 = tpu.transpose %36, [1, 0] : vector<8x16xf32> -> vector<16x8xf32>
    %38 = arith.mulf %35, %35 : vector<8x8xf32>
    %39 = tpu.transpose %38, [1, 0] : vector<8x8xf32> -> vector<8x8xf32>
    %cst_32 = arith.constant dense<0.000000e+00> : vector<8xf32>
    %40 = vector.multi_reduction <add>, %37, %cst_32 [0] : vector<16x8xf32> to vector<8xf32>
    %41 = vector.shape_cast %40 : vector<8xf32> to vector<1x8xf32>
    %42 = math.sqrt %41 : vector<1x8xf32>
    %43 = vector.shape_cast %42 : vector<1x8xf32> to vector<1x1x8xf32>
    %c0_33 = arith.constant 0 : index
    %c0_34 = arith.constant 0 : index
    %c0_35 = arith.constant 0 : index
    %44 = vector.load %arg14[%c0_33, %c0_34, %c0_35] : memref<1x1x8xf32, #tpu.memory_space<vmem>>, vector<1x1x8xf32>
    tpu.vector_store %arg14[%c0_33, %c0_34, %c0_35], %43 {strides = array<i32>} : memref<1x1x8xf32, #tpu.memory_space<vmem>>, vector<1x1x8xf32>,
    %cst_36 = arith.constant dense<0.000000e+00> : vector<8xf32>
    %45 = vector.multi_reduction <add>, %39, %cst_36 [0] : vector<8x8xf32> to vector<8xf32>
    %46 = vector.shape_cast %45 : vector<8xf32> to vector<1x8xf32>
    %47 = math.sqrt %46 : vector<1x8xf32>
    %48 = vector.shape_cast %47 : vector<1x8xf32> to vector<1x1x8xf32>
    %c0_37 = arith.constant 0 : index
    %c0_38 = arith.constant 0 : index
    %c0_39 = arith.constant 0 : index
    %49 = vector.load %arg15[%c0_37, %c0_38, %c0_39] : memref<1x1x8xf32, #tpu.memory_space<vmem>>, vector<1x1x8xf32>
    tpu.vector_store %arg15[%c0_37, %c0_38, %c0_39], %48 {strides = array<i32>} : memref<1x1x8xf32, #tpu.memory_space<vmem>>, vector<1x1x8xf32>,
    return
  }
  func.func @transform_0(%arg0: i32) -> (i32, i32) {
    %c0_i32 = arith.constant 0 : i32
    %c0_i32_0 = arith.constant 0 : i32
    return %arg0, %c0_i32 : i32, i32
  }
  func.func @transform_1(%arg0: i32) -> (i32, i32) {
    %c0_i32 = arith.constant 0 : i32
    %c0_i32_0 = arith.constant 0 : i32
    return %arg0, %c0_i32 : i32, i32
  }
  func.func @transform_2(%arg0: i32) -> (i32, i32) {
    %c0_i32 = arith.constant 0 : i32
    %c0_i32_0 = arith.constant 0 : i32
    return %arg0, %c0_i32 : i32, i32
  }
  func.func @transform_3(%arg0: i32) -> (i32, i32) {
    %c0_i32 = arith.constant 0 : i32
    %c0_i32_0 = arith.constant 0 : i32
    %c0_i32_1 = arith.constant 0 : i32
    return %c0_i32, %c0_i32_0 : i32, i32
  }
  func.func @transform_4(%arg0: i32) -> (i32, i32) {
    %c0_i32 = arith.constant 0 : i32
    %c0_i32_0 = arith.constant 0 : i32
    %c0_i32_1 = arith.constant 0 : i32
    return %c0_i32, %c0_i32_0 : i32, i32
  }
  func.func @transform_5(%arg0: i32) -> (i32, i32) {
    %c0_i32 = arith.constant 0 : i32
    %c0_i32_0 = arith.constant 0 : i32
    %c0_i32_1 = arith.constant 0 : i32
    return %c0_i32, %c0_i32_0 : i32, i32
  }
  func.func @transform_6(%arg0: i32) -> (i32, i32) {
    %c0_i32 = arith.constant 0 : i32
    %c0_i32_0 = arith.constant 0 : i32
    %c0_i32_1 = arith.constant 0 : i32
    return %c0_i32, %c0_i32_0 : i32, i32
  }
  func.func @transform_7(%arg0: i32) -> (i32, i32) {
    %c0_i32 = arith.constant 0 : i32
    %c0_i32_0 = arith.constant 0 : i32
    %c0_i32_1 = arith.constant 0 : i32
    return %c0_i32, %c0_i32_0 : i32, i32
  }
  func.func @transform_8(%arg0: i32) -> (i32, i32) {
    %c0_i32 = arith.constant 0 : i32
    %c0_i32_0 = arith.constant 0 : i32
    %c0_i32_1 = arith.constant 0 : i32
    return %c0_i32, %c0_i32_0 : i32, i32
  }
  func.func @transform_9(%arg0: i32) -> (i32, i32) {
    %c0_i32 = arith.constant 0 : i32
    %c0_i32_0 = arith.constant 0 : i32
    %c0_i32_1 = arith.constant 0 : i32
    return %c0_i32, %c0_i32_0 : i32, i32
  }
  func.func @transform_10(%arg0: i32) -> (i32, i32) {
    %c0_i32 = arith.constant 0 : i32
    %c0_i32_0 = arith.constant 0 : i32
    %c0_i32_1 = arith.constant 0 : i32
    return %c0_i32, %c0_i32_0 : i32, i32
  }
  func.func @transform_11(%arg0: i32) -> (i32, i32) {
    %c0_i32 = arith.constant 0 : i32
    %c0_i32_0 = arith.constant 0 : i32
    %c0_i32_1 = arith.constant 0 : i32
    return %c0_i32, %c0_i32_0 : i32, i32
  }
  func.func @transform_12(%arg0: i32) -> (i32, i32) {
    %c0_i32 = arith.constant 0 : i32
    %c0_i32_0 = arith.constant 0 : i32
    %c0_i32_1 = arith.constant 0 : i32
    return %c0_i32, %c0_i32_0 : i32, i32
  }
  func.func @transform_13(%arg0: i32) -> (i32, i32, i32) {
    %c0_i32 = arith.constant 0 : i32
    %c0_i32_0 = arith.constant 0 : i32
    %c0_i32_1 = arith.constant 0 : i32
    return %arg0, %c0_i32, %c0_i32_0 : i32, i32, i32
  }
  func.func @transform_14(%arg0: i32) -> (i32, i32, i32) {
    %c0_i32 = arith.constant 0 : i32
    %c0_i32_0 = arith.constant 0 : i32
    %c0_i32_1 = arith.constant 0 : i32
    return %arg0, %c0_i32, %c0_i32_0 : i32, i32, i32
  }
}

</mosaic_0001>

<bundles_post_ra>
// kernel: tpu_custom_call.1
= control target key start
LH: loop header
LB: loop body
LE: loop exit
PB: predicated region body
PF: predicated region fallthrough
CT: control target
= control target key end

     0   :  { %20 = vsyncpa [#allocation3], 0  ;;  %vm54_vm0 = vcmask 64512   ;;  %vm78_vm1 = vcmask 130048   ;;  %s594_s0 = inlined_call_operand.vmem [shape: f32[8,16], index: 0, kind: input, shape index: {}]   ;;  %s595_s1 = inlined_call_operand.vmem [shape: f32[8,8], index: 1, kind: input, shape index: {}]   ;;  %s596_s2 = inlined_call_operand.vmem [shape: f32[8,16], index: 2, kind: input, shape index: {}]   ;;  %s597_s3 = inlined_call_operand.vmem [shape: f32[16,32], index: 3, kind: input, shape index: {}]   ;;  %s598_s4 = inlined_call_operand.vmem [shape: f32[8,32], index: 4, kind: input, shape index: {}]   ;;  %s599_s5 = inlined_call_operand.vmem [shape: f32[1,32], index: 5, kind: input, shape index: {}]   ;;  %s600_s6 = inlined_call_operand.vmem [shape: f32[32,16], index: 6, kind: input, shape index: {}]   ;;  %s601_s7 = inlined_call_operand.vmem [shape: f32[1,16], index: 7, kind: input, shape index: {}]   ;;  %s602_s8 = inlined_call_operand.vmem [shape: f32[16,32], index: 8, kind: input, shape index: {}]   ;;  %s603_s9 = inlined_call_operand.vmem [shape: f32[16,32], index: 9, kind: input, shape index: {}]   ;;  %s604_s10 = inlined_call_operand.vmem [shape: f32[1,32], index: 10, kind: input, shape index: {}]   ;;  %s605_s11 = inlined_call_operand.vmem [shape: f32[32,8], index: 11, kind: input, shape index: {}]   ;;  %s606_s12 = inlined_call_operand.vmem [shape: f32[1,8], index: 12, kind: input, shape index: {}]   ;;  %s607_s13 = inlined_call_operand.hbm [shape: f32[1,1,8], index: 13, kind: output, shape index: {0}]   ;;  %s608_s14 = inlined_call_operand.hbm [shape: f32[1,1,8], index: 14, kind: output, shape index: {1}]  }
   0x1   :  { %v52_v0 = vld [vmem:[%s597_s3 + $0x8] sm:$0xff]  ;;  %v53_v1 = vld [vmem:[%s598_s4] sm:$0xff] }
   0x2   :  { %v51_v2 = vld [vmem:[%s597_s3] sm:$0xff]  ;;  %96 = vmatpush.msra.mxu1 %v52_v0  ;;  %73 = vmatpush.msra.mxu0 %v53_v1  ;;  %v143_v5 = vld [vmem:[%s603_s9 + $0x8] sm:$0xff] }
   0x3   :  { %v49_v3 = vld [vmem:[%s595_s1] sm:$0xff]  ;;  %161 = vmatpush.msra.mxu3 %v143_v5  ;;  %v141_v6 = vld [vmem:[%s602_s8 + $0x8] sm:$0xff] }
   0x4   :  { %v48_v4 = vld [vmem:[%s594_s0] sm:$0xff]  ;;  %368 = vmatmul.msk.f32.vlgmr.msra.gmra.mxu0 %vm54_vm0, %v49_v3  ;;  %97 = vmatpush.msra.mxu1 %v51_v2 }
   0x5   :  { %v142_v7 = vld [vmem:[%s603_s9] sm:$0xff]  ;;  %181 = vmatpush.msrb.mxu0 %v141_v6  ;;  %369 = vmatmul.msk.f32.vlgmr.msra.gmra.mxu1 %vm78_vm1, %v48_v4 }
   0x6   :  { %v50_v8 = vld [vmem:[%s596_s2] sm:$0xff]  ;;  %162 = vmatpush.msra.mxu3 %v142_v7 }
   0x7   :  { %v140_v9 = vld [vmem:[%s602_s8] sm:$0xff] }
   0x8   :  { %21 = vsyncpa [#allocation5], 0  ;;  %371 = vmatmul.msk.f32.vlgmr.msra.gmra.mxu3 %vm78_vm1, %v50_v8  ;;  %182 = vmatpush.msrb.mxu0 %v140_v9  ;;  %v111_v10 = vld [vmem:[%s600_s6 + $0x18] sm:$0xff]  ;;  %v110_v11 = vld [vmem:[%s600_s6 + $0x10] sm:$0xff]  ;;  %vm116_vm2 = vcmask 261120   ;;  %s343_s28 = sshll.u32 %s607_s13, 4  ;;  %s344_s28 = int_to_ptr.hbm [resolvable:$true] %s343_s28 }
   0x9   :  { %132 = vmatpush.msra.mxu2 %v111_v10  ;;  %v109_v12 = vld [vmem:[%s600_s6 + $0x8] sm:$0xff]  ;;  %v108_v13 = vld [vmem:[%s600_s6] sm:$0xff]  ;;  %v196_v14 = vld [vmem:[%s605_s11 + $0x18] sm:$0xff]  ;;  %vm314_vm4 = vcmask 57344   ;;  %s440_s29 = smov [#allocation4]   ;;  %s354_s13 = sshll.u32 %s608_s14, 4  ;;  %s355_s13 = int_to_ptr.hbm [resolvable:$true] %s354_s13 }
   0xa   :  { %216 = vmatpush.msrb.mxu1 %v196_v14  ;;  %v195_v15 = vld [vmem:[%s605_s11 + $0x10] sm:$0xff]  ;;  %v194_v16 = vld [vmem:[%s605_s11 + $0x8] sm:$0xff]  ;;  %v193_v17 = vld [vmem:[%s605_s11] sm:$0xff]  ;;  %s352_s30 = sshll.u32 %s440_s29, 4  ;;  %s353_s30 = int_to_ptr.vmem [resolvable:$true] %s352_s30 }
   0xb   :  { %133 = vmatpush.msra.mxu2 %v110_v11  ;;  %v377_v19 = vld [vmem:[%s599_s5] ss:$0 sm:$0xff] }
   0xc   :  { %372 = vmatmul.msk.f32.vlgmr.msrb.gmra.mxu0 %vm78_vm1, %v48_v4  ;;  %217 = vmatpush.msrb.mxu1 %v195_v15  ;;  %v378_v25 = vld [vmem:[%s604_s10] ss:$0 sm:$0xff] }
   0xd   :  { %134 = vmatpush.msra.mxu2 %v109_v12  ;;  %v379_v30 = vld [vmem:[%s601_s7] ss:$0 sm:$0xff]  ;;  %s439_s7 = smov [#allocation2]  }
   0xe   :  { %218 = vmatpush.msrb.mxu1 %v194_v16  ;;  %v380_v31 = vld [vmem:[%s606_s12] ss:$0 sm:$0xff]  ;;  %s341_s10 = sshll.u32 %s439_s7, 4  ;;  %s342_s10 = int_to_ptr.vmem [resolvable:$true] %s341_s10 }
   0xf   :  { %135 = vmatpush.msra.mxu2 %v108_v13 }
  0x10   :  { %219 = vmatpush.msrb.mxu1 %v193_v17 }
  0x81   :  { %v75_v18 = vpop.f32.mrf.mxu0 }
  0x82   :  { %v99_v20 = vpop.f32.mrf.mxu1 }
  0x83   :  { %v100_v21 = vadd.f32 %v99_v20, %v75_v18 }
  0x85   :  { %v106_v22 = vadd.f32 %v377_v19, %v100_v21 }
  0x87   :  { %v107_v23 = vmax.f32 %v106_v22, 0.0 }
  0x89   :  { %v184_v24 = vpop.f32.mrf.mxu0  ;;  %370 = vmatmul.msk.f32.vlgmr.msra.gmra.mxu2 %vm116_vm2, %v107_v23 }
  0x8b   :  { %v164_v26 = vpop.f32.mrf.mxu3 }
  0x8c   :  { %v185_v27 = vadd.f32 %v184_v24, %v164_v26 }
  0x8e   :  { %v191_v28 = vadd.f32 %v378_v25, %v185_v27 }
  0x90   :  { %v192_v29 = vmax.f32 %v191_v28, 0.0 }
  0x92   :  { %373 = vmatmul.msk.f32.vlgmr.msrb.gmra.mxu1 %vm116_vm2, %v192_v29 }
 0x10c   :  { %v137_v32 = vpop.f32.mrf.mxu2 }
 0x10d   :  { %v138_v33 = vadd.f32 %v379_v30, %v137_v32 }
 0x10f   :  { %v221_v34 = vpop.f32.mrf.mxu1  ;;  %v225_v36 = vsub.f32 %v50_v8, %v138_v33 }
 0x110   :  { %v222_v35 = vadd.f32 %v380_v31, %v221_v34 }
 0x111   :  { %v227_v37 = vmul.f32 %v225_v36, %v225_v36 }
 0x112   :  { %381 = vtanh.f32 %v222_v35 }
 0x113   :  { %228 = vxpose.xlu0.b32.start.end [1/1] (short) (narrow) %v227_v37, 16 }
 0x118   :  { %v382_v38 = vpop.eup %381 }
 0x119   :  { %v226_v39 = vsub.f32 %v49_v3, %v382_v38 }
 0x11b   :  { %v260_v40 = vmul.f32 %v226_v39, %v226_v39 }
 0x123   :  { %261 = vxpose.xlu0.b32.start.end [1/1] (short) (narrow) %v260_v40, 8 }
 0x1b7   :  { %v244_v41 = vpop.trf.xlu0 }
 0x1b8   :  { %v293_v43 = vsel %vm54_vm0, %v244_v41, 0.0 }
 0x1bf   :  { %v245_v42 = vpop.trf.xlu0 }
 0x1c0   :  { %v294_v44 = vsel %vm54_vm0, %v245_v42, 0.0 }
 0x1c1   :  { %v295_v45 = vadd.f32 %v294_v44, %v293_v43 }
 0x1c3   :  { %v296_v46 = vrot.slane %v295_v45, 4 }
 0x1c5   :  { %v297_v47 = vadd.f32 %v296_v46, %v295_v45 }
 0x1c7   :  { %v298_v48 = vrot.slane %v297_v47, 2  ;;  %v277_v49 = vpop.trf.xlu0 }
 0x1c8   :  { %v316_v50 = vsel %vm54_vm0, %v277_v49, 0.0 }
 0x1c9   :  { %v299_v51 = vadd.f32 %v298_v48, %v297_v47  ;;  %v317_v52 = vrot.slane %v316_v50, 4 }
 0x1cb   :  { %v300_v53 = vrot.slane %v299_v51, 1  ;;  %v318_v54 = vadd.f32 %v317_v52, %v316_v50 }
 0x1cd   :  { %v301_v55 = vadd.f32 %v300_v53, %v299_v51  ;;  %v319_v56 = vrot.slane %v318_v54, 2 }
 0x1cf   :  { %v320_v57 = vadd.f32 %v319_v56, %v318_v54  ;;  %383 = vrsqrt.f32 %v301_v55  ;;  %vm309_vm3 = vcmp.eq.f32.partialorder %v301_v55, inf  ;;  %v312_v7 = vand.u32 2147483648, %v301_v55 }
 0x1d0   :  { %vm311_vm5 = vcmp.eq.f32.partialorder %v301_v55, 0.0 }
 0x1d1   :  { %v321_v58 = vrot.slane %v320_v57, 1 }
 0x1d3   :  { %v322_v59 = vadd.f32 %v321_v58, %v320_v57 }
 0x1d5   :  { %v384_v60 = vpop.eup %383  ;;  %385 = vrsqrt.f32 %v322_v59  ;;  %vm330_vm6 = vcmp.eq.f32.partialorder %v322_v59, inf  ;;  %v333_v13 = vand.u32 2147483648, %v322_v59  ;;  %vm332_vm7 = vcmp.eq.f32.partialorder %v322_v59, 0.0 }
 0x1d6   :  { %v303_v61 = vmul.f32 %v384_v60, %v301_v55 }
 0x1d8   :  { %v304_v62 = vmul.f32 %v384_v60, %v303_v61 }
 0x1da   :  { %v305_v63 = vmul.f32 0.5, %v304_v62 }
 0x1db   :  { %v386_v0 = vpop.eup %385 }
 0x1dc   :  { %v306_v1 = vsub.f32 1.5, %v305_v63  ;;  %v324_v2 = vmul.f32 %v386_v0, %v322_v59 }
 0x1de   :  { %v307_v3 = vmul.f32 %v384_v60, %v306_v1  ;;  %v325_v4 = vmul.f32 %v386_v0, %v324_v2 }
 0x1e0   :  { %v308_v5 = vmul.f32 %v307_v3, %v301_v55  ;;  %v326_v6 = vmul.f32 0.5, %v325_v4 }
 0x1e2   :  { %v310_v8 = vsel %vm309_vm3, %v301_v55, %v308_v5  ;;  %v327_v9 = vsub.f32 1.5, %v326_v6 }
 0x1e3   :  { %v313_v10 = vsel %vm311_vm5, %v312_v7, %v310_v8 }
 0x1e4   :  { %315 = vst.msk [vmem:[#allocation2] sm:$0x1] %vm314_vm4, %v313_v10  ;;  %v328_v11 = vmul.f32 %v386_v0, %v327_v9 }
 0x1e5   :  { %346 = dma.vmem_to_hbm [thread:$0]  %s342_s10, 16, %s344_s28, [#allocation3]  }
 0x1e6   :  { %v329_v12 = vmul.f32 %v328_v11, %v322_v59 }
 0x1e8   :  { %v331_v14 = vsel %vm330_vm6, %v322_v59, %v329_v12 }
 0x1e9   :  { %v334_v15 = vsel %vm332_vm7, %v333_v13, %v331_v14 }
 0x1ea   :  { %335 = vst.msk [vmem:[#allocation4] sm:$0x1] %vm314_vm4, %v334_v15 }
 0x1eb   :  { %357 = dma.vmem_to_hbm [thread:$0]  %s353_s30, 16, %s355_s13, [#allocation5]  }
 0x1ec   :  { %435 = dma.done.wait [#allocation3], 16  }
 0x1ed   :  { %436 = vsyncadd [#allocation3], 4294967280 }
 0x1ee   :  { %437 = dma.done.wait [#allocation5], 16  }
 0x1ef   :  { %438 = vsyncadd [#allocation5], 4294967280 }
 0x1f0   :  { %366 = vsyncpa [#allocation3], 1 }
 0x1f1   :  { %367 = vsyncpa [#allocation5], 1 }

</bundles_post_ra>
